<compile_context>
chip_gen: v6e
topology: v6e:2x2x1
jax: 0.10.0
libtpu: 0.0.40
codegen_flags: <defaults>
</compile_context>

<pallas_src>
import jax
import jax.numpy as jnp
from jax.experimental import pallas as pl
from jax.experimental.pallas import tpu as pltpu


_LANES = 128        # vreg lane width
_SUBLANES = 8       # vreg sublane count (f32)
_TILE_ROWS = 1024   # 1024 x 128 f32 = 512 KiB per block; 3 in + 3 out,
                    # double-buffered => ~6 MiB peak, safe on v5e/v6e/v7x.


# ---------------------------------------------------------------------------
# Pallas kernel: fused identity copy of three lane-dense slabs.
# ---------------------------------------------------------------------------
def _fused_passthrough_kernel(v_ref, p_ref, d_ref, ov_ref, op_ref, od_ref):
    ov_ref[...] = v_ref[...]
    op_ref[...] = p_ref[...]
    od_ref[...] = d_ref[...]


def _pad_to_slab(x):
    """Flatten x and pad to a lane-dense (padded_rows, 128) slab.

    Returns (slab, block_rows, n_blocks) where block_rows is the per-tensor
    row-tile size (multiple of 8, capped at _TILE_ROWS) and n_blocks the
    number of row tiles.
    """
    n = x.size
    rows = pl.cdiv(n, _LANES)
    rows8 = pl.cdiv(rows, _SUBLANES) * _SUBLANES              # sublane align
    block_rows = min(_TILE_ROWS, rows8)                        # multiple of 8
    padded_rows = pl.cdiv(rows8, block_rows) * block_rows
    padded = padded_rows * _LANES
    flat = x.reshape(-1)
    if padded != n:
        flat = jnp.pad(flat, (0, padded - n))
    slab = flat.reshape(padded_rows, _LANES)
    return slab, block_rows, padded_rows // block_rows


def _fused_passthrough(kp_val, prob, duration):
    tensors = (kp_val, prob, duration)
    slabs, block_rows, nblocks = zip(*(_pad_to_slab(t) for t in tensors))

    num_steps = max(nblocks)
    grid = (num_steps,)

    def make_idx_map(nb):
        if nb == num_steps:
            return lambda i: (i, 0)
        # Smaller tensor: clamp to its last block. Once clamped, the block
        # index stops changing, so Pallas issues no further HBM DMA for it
        # and writes the block back exactly once.
        last = nb - 1
        return lambda i: (jnp.minimum(i, last), 0)

    in_specs = [
        pl.BlockSpec((br, _LANES), make_idx_map(nb))
        for br, nb in zip(block_rows, nblocks)
    ]
    out_specs = tuple(
        pl.BlockSpec((br, _LANES), make_idx_map(nb))
        for br, nb in zip(block_rows, nblocks)
    )
    out_shape = tuple(jax.ShapeDtypeStruct(s.shape, s.dtype) for s in slabs)

    # Output blocks are revisited only when clamping kicks in (unequal tile
    # counts); in that case keep the grid axis sequential for safety.
    semantics = ("parallel",) if len(set(nblocks)) == 1 else ("arbitrary",)

    outs = pl.pallas_call(
        _fused_passthrough_kernel,
        out_shape=out_shape,
        grid=grid,
        in_specs=in_specs,
        out_specs=out_specs,
        input_output_aliases={0: 0, 1: 1, 2: 2},
        compiler_params=pltpu.CompilerParams(
            dimension_semantics=semantics,
            vmem_limit_bytes=32 * 1024 * 1024,
        ),
    )(*slabs)

    results = []
    for t, o in zip(tensors, outs):
        results.append(o.reshape(-1)[: t.size].reshape(t.shape))
    return tuple(results)


_fused_passthrough_jit = jax.jit(_fused_passthrough)


# ---------------------------------------------------------------------------
# KP_Oracle module equivalent.
# ---------------------------------------------------------------------------
class KPOracle:
    def __init__(self, fixed_duration: bool = False):
        # LayerNormGRUCell(input_size=1, hidden_size=1) parameters — never
        # used in forward(); mirrored only so the parameter set matches.
        key = jax.random.PRNGKey(42)
        k1, k2 = jax.random.split(key, 2)
        self.dumm_cell_params = {
            "weight_ih": jax.random.normal(k1, (3, 1), jnp.float32) * 0.1,
            "weight_hh": jax.random.normal(k2, (3, 1), jnp.float32) * 0.1,
            "bias_ih": jnp.zeros((3,), jnp.float32),
            "bias_hh": jnp.zeros((3,), jnp.float32),
            "ln_gamma": jnp.ones((3,), jnp.float32),
            "ln_beta": jnp.zeros((3,), jnp.float32),
        }

    def is_oracle(self) -> bool:
        return True

    def initHidden(self, is_cuda, batch_size):
        return None

    def forward(self, kp_inputs, hidden_states, kp_outputs):
        kp_val, prob, duration = kp_outputs
        kp_val_out, prob_out, duration_out = _fused_passthrough_jit(
            kp_val, prob, duration
        )
        return (kp_val_out, prob_out, duration_out, None)

    __call__ = forward


# ---------------------------------------------------------------------------
# Demo / self-test.
# ---------------------------------------------------------------------------
if __name__ == "__main__":
    key = jax.random.PRNGKey(0)
    k_in, k_hid, k_val, k_prob, k_dur = jax.random.split(key, 5)

    batch, seq, hidden, n_kp = 2, 8, 32, 4

    kp_inputs = jax.random.normal(k_in, (batch, seq, hidden), jnp.float32)
    hidden_states = jax.random.normal(k_hid, (batch, hidden), jnp.float32)
    kp_val = jax.random.normal(k_val, (batch, seq, n_kp), jnp.float32)
    prob = jax.nn.sigmoid(jax.random.normal(k_prob, (batch, seq, 1), jnp.float32))
    duration = jax.nn.softplus(jax.random.normal(k_dur, (batch, seq, 1), jnp.float32))
    kp_outputs = (kp_val, prob, duration)

    oracle = KPOracle()
    out_val, out_prob, out_dur, out_none = oracle(kp_inputs, hidden_states, kp_outputs)

    jax.block_until_ready((out_val, out_prob, out_dur))

    assert out_none is None
    assert jnp.array_equal(out_val, kp_val)
    assert jnp.array_equal(out_prob, prob)
    assert jnp.array_equal(out_dur, duration)
    assert out_val.dtype == kp_val.dtype and out_val.shape == kp_val.shape
    assert out_prob.dtype == prob.dtype and out_prob.shape == prob.shape
    assert out_dur.dtype == duration.dtype and out_dur.shape == duration.shape

    print("KERNEL_OK")
</pallas_src>

<mosaic_0001>
module attributes {stable_mosaic.version = 11 : i64} {
  func.func @_fused_passthrough_kernel(%arg0: i32, %arg1: memref<8x128xf32, #tpu.memory_space<vmem>>, %arg2: memref<8x128xf32, #tpu.memory_space<vmem>>, %arg3: memref<8x128xf32, #tpu.memory_space<vmem>>, %arg4: memref<8x128xf32, #tpu.memory_space<vmem>>, %arg5: memref<8x128xf32, #tpu.memory_space<vmem>>, %arg6: memref<8x128xf32, #tpu.memory_space<vmem>>) attributes {dimension_semantics = [#tpu.dimension_semantics<parallel>], iteration_bounds = array<i64: 1>, scalar_prefetch = 0 : i64, scratch_operands = 0 : i64, tpu.core_type = #tpu.core_type<tc>, window_params = [{transform_indices = @transform_0, window_bounds = array<i64: 8, 128>}, {transform_indices = @transform_1, window_bounds = array<i64: 8, 128>}, {transform_indices = @transform_2, window_bounds = array<i64: 8, 128>}, {transform_indices = @transform_3, window_bounds = array<i64: 8, 128>}, {transform_indices = @transform_4, window_bounds = array<i64: 8, 128>}, {transform_indices = @transform_5, window_bounds = array<i64: 8, 128>}]} {
    %c0 = arith.constant 0 : index
    %c0_0 = arith.constant 0 : index
    %0 = vector.load %arg1[%c0, %c0_0] : memref<8x128xf32, #tpu.memory_space<vmem>>, vector<8x128xf32>
    %c0_1 = arith.constant 0 : index
    %c0_2 = arith.constant 0 : index
    %1 = vector.load %arg4[%c0_1, %c0_2] : memref<8x128xf32, #tpu.memory_space<vmem>>, vector<8x128xf32>
    tpu.vector_store %arg4[%c0_1, %c0_2], %0 {strides = array<i32>} : memref<8x128xf32, #tpu.memory_space<vmem>>, vector<8x128xf32>,
    %c0_3 = arith.constant 0 : index
    %c0_4 = arith.constant 0 : index
    %2 = vector.load %arg2[%c0_3, %c0_4] : memref<8x128xf32, #tpu.memory_space<vmem>>, vector<8x128xf32>
    %c0_5 = arith.constant 0 : index
    %c0_6 = arith.constant 0 : index
    %3 = vector.load %arg5[%c0_5, %c0_6] : memref<8x128xf32, #tpu.memory_space<vmem>>, vector<8x128xf32>
    tpu.vector_store %arg5[%c0_5, %c0_6], %2 {strides = array<i32>} : memref<8x128xf32, #tpu.memory_space<vmem>>, vector<8x128xf32>,
    %c0_7 = arith.constant 0 : index
    %c0_8 = arith.constant 0 : index
    %4 = vector.load %arg3[%c0_7, %c0_8] : memref<8x128xf32, #tpu.memory_space<vmem>>, vector<8x128xf32>
    %c0_9 = arith.constant 0 : index
    %c0_10 = arith.constant 0 : index
    %5 = vector.load %arg6[%c0_9, %c0_10] : memref<8x128xf32, #tpu.memory_space<vmem>>, vector<8x128xf32>
    tpu.vector_store %arg6[%c0_9, %c0_10], %4 {strides = array<i32>} : memref<8x128xf32, #tpu.memory_space<vmem>>, vector<8x128xf32>,
    return
  }
  func.func @transform_0(%arg0: i32) -> (i32, i32) {
    %c0_i32 = arith.constant 0 : i32
    %c0_i32_0 = arith.constant 0 : i32
    return %arg0, %c0_i32 : i32, i32
  }
  func.func @transform_1(%arg0: i32) -> (i32, i32) {
    %c0_i32 = arith.constant 0 : i32
    %c0_i32_0 = arith.constant 0 : i32
    return %arg0, %c0_i32 : i32, i32
  }
  func.func @transform_2(%arg0: i32) -> (i32, i32) {
    %c0_i32 = arith.constant 0 : i32
    %c0_i32_0 = arith.constant 0 : i32
    return %arg0, %c0_i32 : i32, i32
  }
  func.func @transform_3(%arg0: i32) -> (i32, i32) {
    %c0_i32 = arith.constant 0 : i32
    %c0_i32_0 = arith.constant 0 : i32
    return %arg0, %c0_i32 : i32, i32
  }
  func.func @transform_4(%arg0: i32) -> (i32, i32) {
    %c0_i32 = arith.constant 0 : i32
    %c0_i32_0 = arith.constant 0 : i32
    return %arg0, %c0_i32 : i32, i32
  }
  func.func @transform_5(%arg0: i32) -> (i32, i32) {
    %c0_i32 = arith.constant 0 : i32
    %c0_i32_0 = arith.constant 0 : i32
    return %arg0, %c0_i32 : i32, i32
  }
}

</mosaic_0001>

<bundles_post_ra>
// kernel: _fused_passthrough.1
= control target key start
LH: loop header
LB: loop body
LE: loop exit
PB: predicated region body
PF: predicated region fallthrough
CT: control target
= control target key end

     0   :  { %s83_s0 = inlined_call_operand.vmem [shape: f32[8,128], index: 0, kind: input, shape index: {}, may-alias: {0,3}]   ;;  %s84_s3 = inlined_call_operand.vmem [shape: f32[8,128], index: 3, kind: output, shape index: {0}, may-alias: {0,3}]   ;;  %s85_s1 = inlined_call_operand.vmem [shape: f32[8,128], index: 1, kind: input, shape index: {}, may-alias: {1,4}]   ;;  %s86_s4 = inlined_call_operand.vmem [shape: f32[8,128], index: 4, kind: output, shape index: {1}, may-alias: {1,4}]   ;;  %s87_s2 = inlined_call_operand.vmem [shape: f32[8,128], index: 2, kind: input, shape index: {}, may-alias: {2,5}]   ;;  %s88_s5 = inlined_call_operand.vmem [shape: f32[8,128], index: 5, kind: output, shape index: {2}, may-alias: {2,5}]  }
   0x1   :  { %v17_v0 = vld [vmem:[%s83_s0] sm:$0xff] }
   0x2   :  { %v19_v1 = vld [vmem:[%s85_s1] sm:$0xff]  ;;  %18 = vst [vmem:[%s84_s3] sm:$0xff] %v17_v0 }
   0x3   :  { %v21_v2 = vld [vmem:[%s87_s2] sm:$0xff]  ;;  %20 = vst [vmem:[%s86_s4] sm:$0xff] %v19_v1 }
   0x4   :  { %22 = vst [vmem:[%s88_s5] sm:$0xff] %v21_v2 }

</bundles_post_ra>
